<compile_context>
chip_gen: v7x
topology: tpu7x:2x2x1
jax: 0.10.0
libtpu: 0.0.40
codegen_flags: <defaults>
</compile_context>

<pallas_src>
import jax
import jax.numpy as jnp
from jax.experimental import pallas as pl
from jax.experimental.pallas import tpu as pltpu

LANES = 128


def _round_up(n, m):
    return ((n + m - 1) // m) * m


# ----------------------------------------------------------------------------
# Kernel: 3 MXU matmuls per batch tile (fused enc+fc1 -> ReLU -> fc2 -> ReLU
# -> fc3), f32 accumulation, bf16 activations and bf16 output stores.
# ----------------------------------------------------------------------------
def cpvae_kernel(x_ref, w01_ref, b01_ref, w2_ref, b2_ref, w3_ref, b3_ref,
                 out_ref):
    # fused (encoders + concat + fc1) : x @ W01 + b01, then ReLU
    h = jnp.dot(x_ref[...], w01_ref[...],
                preferred_element_type=jnp.float32) + b01_ref[...]
    h = jnp.maximum(h, 0.0).astype(jnp.bfloat16)

    # fc2 + ReLU
    h = jnp.dot(h, w2_ref[...],
                preferred_element_type=jnp.float32) + b2_ref[...]
    h = jnp.maximum(h, 0.0).astype(jnp.bfloat16)

    # fc3 (lane-dense, zero-padded output columns), bf16 writeback
    o = jnp.dot(h, w3_ref[...],
                preferred_element_type=jnp.float32) + b3_ref[...]
    out_ref[...] = o.astype(out_ref.dtype)


# ----------------------------------------------------------------------------
# One-time parameter preparation (fusion, padding, bf16 casts). Call once and
# reuse the result for every forward call.
# ----------------------------------------------------------------------------
def prepare_params(params):
    (w1e, b1e, w3e, b3e, wf1, bf1, wf2, bf2, wf3, bf3) = params
    F = w1e.shape[0]
    H1, H2, O = wf1.shape[1], wf2.shape[1], wf3.shape[1]

    # exact linear fusion of the two encoder mu-heads + fc1 (f32)
    w01 = jnp.concatenate([w1e, w3e], axis=1) @ wf1          # (F, H1)
    b01 = jnp.concatenate([b1e, b3e], axis=1) @ wf1 + bf1    # (1, H1)

    # pad hidden/output widths to 128 lanes (zero cols/rows; ReLU(0)=0 exact)
    H1p = _round_up(max(H1, LANES), LANES)
    H2p = _round_up(max(H2, LANES), LANES)
    Op = _round_up(max(O, LANES), LANES)

    w01_p = jnp.zeros((F, H1p), jnp.bfloat16).at[:, :H1].set(
        w01.astype(jnp.bfloat16))
    b01_p = jnp.zeros((1, H1p), jnp.float32).at[:, :H1].set(
        b01.astype(jnp.float32))
    w2_p = jnp.zeros((H1p, H2p), jnp.bfloat16).at[:H1, :H2].set(
        wf2.astype(jnp.bfloat16))
    b2_p = jnp.zeros((1, H2p), jnp.float32).at[:, :H2].set(
        bf2.astype(jnp.float32))
    w3_p = jnp.zeros((H2p, Op), jnp.bfloat16).at[:H2, :O].set(
        wf3.astype(jnp.bfloat16))
    b3_p = jnp.zeros((1, Op), jnp.float32).at[:, :O].set(
        bf3.astype(jnp.float32))

    prepared = (w01_p, b01_p, w2_p, b2_p, w3_p, b3_p)
    return prepared, O


# ----------------------------------------------------------------------------
# Forward pass. x: (B, F) float32 -> (B, O) bfloat16 logits.
# ----------------------------------------------------------------------------
def cpvae_forward(x, prepared, out_dim, *, tb=None):
    w01, b01, w2, b2, w3, b3 = prepared
    B, F = x.shape
    H1p = w01.shape[1]
    H2p = w2.shape[1]
    Op = w3.shape[1]

    # Batch tile: big (<=512 rows) to amortize per-step overhead, but keep the
    # grid length >= 2 so both v7x TensorCores are used; sublane-aligned (x8).
    if tb is None:
        tb = min(512, _round_up(max(1, pl.cdiv(B, 2)), 8))
    tb = max(8, min(tb, _round_up(B, 8)))
    grid = (pl.cdiv(B, tb),)

    x_bf = x.astype(jnp.bfloat16)

    flops = 2 * B * (F * H1p + H1p * H2p + H2p * Op)
    bytes_accessed = (B * F * 2 + B * Op * 2                       # x in, out
                      + (w01.size + w2.size + w3.size) * 2         # bf16 weights
                      + (b01.size + b2.size + b3.size) * 4)        # f32 biases

    def wmap(i):  # whole weight/bias array at every grid step
        return (0, 0)

    out = pl.pallas_call(
        cpvae_kernel,
        out_shape=jax.ShapeDtypeStruct((B, Op), jnp.bfloat16),
        grid_spec=pl.GridSpec(
            grid=grid,
            in_specs=[
                pl.BlockSpec((tb, F), lambda i: (i, 0)),   # x (batch-tiled, unpadded F)
                pl.BlockSpec((F, H1p), wmap),              # fused enc+fc1 weights
                pl.BlockSpec((1, H1p), wmap),              # fused bias
                pl.BlockSpec((H1p, H2p), wmap),            # fc2 weights
                pl.BlockSpec((1, H2p), wmap),              # fc2 bias
                pl.BlockSpec((H2p, Op), wmap),             # fc3 weights (padded cols)
                pl.BlockSpec((1, Op), wmap),               # fc3 bias
            ],
            out_specs=pl.BlockSpec((tb, Op), lambda i: (i, 0)),
        ),
        compiler_params=pltpu.CompilerParams(
            dimension_semantics=("parallel",)),
        cost_estimate=pl.CostEstimate(flops=flops, transcendentals=0,
                                      bytes_accessed=bytes_accessed),
    )(x_bf, w01, b01, w2, b2, w3, b3)

    # Padded lanes are zero; under jit this slice fuses into the consumer.
    return out[:, :out_dim]


# ----------------------------------------------------------------------------
# Deterministic PyTorch-style Linear init and a pure-JAX f32 reference.
# ----------------------------------------------------------------------------
def init_params(key, feature_dim, latent1, latent3, output_size):
    def linear(k, fan_in, fan_out):
        kw, kb = jax.random.split(k)
        bound = 1.0 / jnp.sqrt(fan_in)
        w = jax.random.uniform(kw, (fan_in, fan_out), jnp.float32, -bound, bound)
        b = jax.random.uniform(kb, (1, fan_out), jnp.float32, -bound, bound)
        return w, b

    ks = jax.random.split(key, 5)
    input_size = latent1 + latent3
    w1e, b1e = linear(ks[0], feature_dim, latent1)   # model1 encoder mu-head
    w3e, b3e = linear(ks[1], feature_dim, latent3)   # model3 encoder mu-head
    wf1, bf1 = linear(ks[2], input_size, 64)         # nn.Linear(input_size, 64)
    wf2, bf2 = linear(ks[3], 64, 64)                 # nn.Linear(64, 64)
    wf3, bf3 = linear(ks[4], 64, output_size)        # nn.Linear(64, output_size)
    return (w1e, b1e, w3e, b3e, wf1, bf1, wf2, bf2, wf3, bf3)


def reference_forward(x, params):
    (w1e, b1e, w3e, b3e, wf1, bf1, wf2, bf2, wf3, bf3) = params
    x1 = x @ w1e + b1e
    x3 = x @ w3e + b3e
    h = jnp.concatenate([x1, x3], axis=1)
    h = jax.nn.relu(h @ wf1 + bf1)
    h = jax.nn.relu(h @ wf2 + bf2)
    return h @ wf3 + bf3


if __name__ == "__main__":
    key = jax.random.PRNGKey(0)
    k_x, k_p = jax.random.split(key)

    B, F = 300, 32         # batch (ragged over 2 tiles), feature dim
    L1, L3 = 16, 16        # latent dims of model1 / model3
    OUT = 2                # output_size (Benign / SlowDoS)

    x = jax.random.normal(k_x, (B, F), dtype=jnp.float32)
    params = init_params(k_p, F, L1, L3, OUT)

    # one-time weight fusion / padding; reuse for all subsequent calls
    prepared, out_dim = prepare_params(params)
    prepared = jax.block_until_ready(prepared)

    fwd = jax.jit(lambda xx: cpvae_forward(xx, prepared, out_dim))
    logits = jax.block_until_ready(fwd(x))

    ref = reference_forward(x, params)
    assert logits.shape == (B, OUT)
    # bf16 weights/activations/output vs f32 reference -> ~1% tolerance
    diff = jnp.abs(logits.astype(jnp.float32) - ref)
    max_err = float(jnp.max(diff))
    assert jnp.allclose(logits.astype(jnp.float32), ref,
                        atol=5e-2, rtol=5e-2), \
        f"mismatch vs reference (max abs err {max_err})"

    print("KERNEL_OK")
</pallas_src>

<mosaic_0001>
module attributes {stable_mosaic.version = 11 : i64} {
  func.func @cpvae_kernel(%arg0: i32, %arg1: memref<152x32xbf16, #tpu.memory_space<vmem>>, %arg2: memref<32x128xbf16, #tpu.memory_space<vmem>>, %arg3: memref<1x128xf32, #tpu.memory_space<vmem>>, %arg4: memref<128x128xbf16, #tpu.memory_space<vmem>>, %arg5: memref<1x128xf32, #tpu.memory_space<vmem>>, %arg6: memref<128x128xbf16, #tpu.memory_space<vmem>>, %arg7: memref<1x128xf32, #tpu.memory_space<vmem>>, %arg8: memref<152x128xbf16, #tpu.memory_space<vmem>>) attributes {dimension_semantics = [#tpu.dimension_semantics<parallel>], iteration_bounds = array<i64: 2>, scalar_prefetch = 0 : i64, scratch_operands = 0 : i64, tpu.core_type = #tpu.core_type<tc>, window_params = [{transform_indices = @transform_0, window_bounds = array<i64: 152, 32>}, {pipeline_mode = #tpu.pipeline_mode<synchronous>, transform_indices = @transform_1, window_bounds = array<i64: 32, 128>}, {pipeline_mode = #tpu.pipeline_mode<synchronous>, transform_indices = @transform_2, window_bounds = array<i64: 1, 128>}, {pipeline_mode = #tpu.pipeline_mode<synchronous>, transform_indices = @transform_3, window_bounds = array<i64: 128, 128>}, {pipeline_mode = #tpu.pipeline_mode<synchronous>, transform_indices = @transform_4, window_bounds = array<i64: 1, 128>}, {pipeline_mode = #tpu.pipeline_mode<synchronous>, transform_indices = @transform_5, window_bounds = array<i64: 128, 128>}, {pipeline_mode = #tpu.pipeline_mode<synchronous>, transform_indices = @transform_6, window_bounds = array<i64: 1, 128>}, {transform_indices = @transform_7, window_bounds = array<i64: 152, 128>}]} {
    %c0 = arith.constant 0 : index
    %c0_0 = arith.constant 0 : index
    %0 = vector.load %arg1[%c0, %c0_0] : memref<152x32xbf16, #tpu.memory_space<vmem>>, vector<152x32xbf16>
    %c0_1 = arith.constant 0 : index
    %c0_2 = arith.constant 0 : index
    %1 = vector.load %arg2[%c0_1, %c0_2] : memref<32x128xbf16, #tpu.memory_space<vmem>>, vector<32x128xbf16>
    %cst = arith.constant dense<0.000000e+00> : vector<152x128xf32>
    %2 = tpu.matmul %0, %1, %cst {dimension_numbers = #tpu.dot_dimension_numbers<[1], [0], [0], [1], [0, 0, 1, 1], [], []>} : vector<152x32xbf16>, vector<32x128xbf16>, vector<152x128xf32> -> vector<152x128xf32>
    %c0_3 = arith.constant 0 : index
    %c0_4 = arith.constant 0 : index
    %3 = vector.load %arg3[%c0_3, %c0_4] : memref<1x128xf32, #tpu.memory_space<vmem>>, vector<1x128xf32>
    %4 = vector.broadcast %3 : vector<1x128xf32> to vector<152x128xf32>
    %5 = arith.addf %2, %4 : vector<152x128xf32>
    %cst_5 = arith.constant 0.000000e+00 : f32
    %6 = vector.broadcast %cst_5 : f32 to vector<152x128xf32>
    %7 = arith.maximumf %5, %6 : vector<152x128xf32>
    %8 = arith.truncf %7 : vector<152x128xf32> to vector<152x128xbf16>
    %c0_6 = arith.constant 0 : index
    %c0_7 = arith.constant 0 : index
    %9 = vector.load %arg4[%c0_6, %c0_7] : memref<128x128xbf16, #tpu.memory_space<vmem>>, vector<128x128xbf16>
    %cst_8 = arith.constant dense<0.000000e+00> : vector<152x128xf32>
    %10 = tpu.matmul %8, %9, %cst_8 {dimension_numbers = #tpu.dot_dimension_numbers<[1], [0], [0], [1], [0, 0, 1, 1], [], []>} : vector<152x128xbf16>, vector<128x128xbf16>, vector<152x128xf32> -> vector<152x128xf32>
    %c0_9 = arith.constant 0 : index
    %c0_10 = arith.constant 0 : index
    %11 = vector.load %arg5[%c0_9, %c0_10] : memref<1x128xf32, #tpu.memory_space<vmem>>, vector<1x128xf32>
    %12 = vector.broadcast %11 : vector<1x128xf32> to vector<152x128xf32>
    %13 = arith.addf %10, %12 : vector<152x128xf32>
    %cst_11 = arith.constant 0.000000e+00 : f32
    %14 = vector.broadcast %cst_11 : f32 to vector<152x128xf32>
    %15 = arith.maximumf %13, %14 : vector<152x128xf32>
    %16 = arith.truncf %15 : vector<152x128xf32> to vector<152x128xbf16>
    %c0_12 = arith.constant 0 : index
    %c0_13 = arith.constant 0 : index
    %17 = vector.load %arg6[%c0_12, %c0_13] : memref<128x128xbf16, #tpu.memory_space<vmem>>, vector<128x128xbf16>
    %cst_14 = arith.constant dense<0.000000e+00> : vector<152x128xf32>
    %18 = tpu.matmul %16, %17, %cst_14 {dimension_numbers = #tpu.dot_dimension_numbers<[1], [0], [0], [1], [0, 0, 1, 1], [], []>} : vector<152x128xbf16>, vector<128x128xbf16>, vector<152x128xf32> -> vector<152x128xf32>
    %c0_15 = arith.constant 0 : index
    %c0_16 = arith.constant 0 : index
    %19 = vector.load %arg7[%c0_15, %c0_16] : memref<1x128xf32, #tpu.memory_space<vmem>>, vector<1x128xf32>
    %20 = vector.broadcast %19 : vector<1x128xf32> to vector<152x128xf32>
    %21 = arith.addf %18, %20 : vector<152x128xf32>
    %22 = arith.truncf %21 : vector<152x128xf32> to vector<152x128xbf16>
    %c0_17 = arith.constant 0 : index
    %c0_18 = arith.constant 0 : index
    %23 = vector.load %arg8[%c0_17, %c0_18] : memref<152x128xbf16, #tpu.memory_space<vmem>>, vector<152x128xbf16>
    tpu.vector_store %arg8[%c0_17, %c0_18], %22 {strides = array<i32>} : memref<152x128xbf16, #tpu.memory_space<vmem>>, vector<152x128xbf16>,
    return
  }
  func.func @transform_0(%arg0: i32) -> (i32, i32) {
    %c0_i32 = arith.constant 0 : i32
    %c0_i32_0 = arith.constant 0 : i32
    return %arg0, %c0_i32 : i32, i32
  }
  func.func @transform_1(%arg0: i32) -> (i32, i32) {
    %c0_i32 = arith.constant 0 : i32
    %c0_i32_0 = arith.constant 0 : i32
    %c0_i32_1 = arith.constant 0 : i32
    return %c0_i32, %c0_i32_0 : i32, i32
  }
  func.func @transform_2(%arg0: i32) -> (i32, i32) {
    %c0_i32 = arith.constant 0 : i32
    %c0_i32_0 = arith.constant 0 : i32
    %c0_i32_1 = arith.constant 0 : i32
    return %c0_i32, %c0_i32_0 : i32, i32
  }
  func.func @transform_3(%arg0: i32) -> (i32, i32) {
    %c0_i32 = arith.constant 0 : i32
    %c0_i32_0 = arith.constant 0 : i32
    %c0_i32_1 = arith.constant 0 : i32
    return %c0_i32, %c0_i32_0 : i32, i32
  }
  func.func @transform_4(%arg0: i32) -> (i32, i32) {
    %c0_i32 = arith.constant 0 : i32
    %c0_i32_0 = arith.constant 0 : i32
    %c0_i32_1 = arith.constant 0 : i32
    return %c0_i32, %c0_i32_0 : i32, i32
  }
  func.func @transform_5(%arg0: i32) -> (i32, i32) {
    %c0_i32 = arith.constant 0 : i32
    %c0_i32_0 = arith.constant 0 : i32
    %c0_i32_1 = arith.constant 0 : i32
    return %c0_i32, %c0_i32_0 : i32, i32
  }
  func.func @transform_6(%arg0: i32) -> (i32, i32) {
    %c0_i32 = arith.constant 0 : i32
    %c0_i32_0 = arith.constant 0 : i32
    %c0_i32_1 = arith.constant 0 : i32
    return %c0_i32, %c0_i32_0 : i32, i32
  }
  func.func @transform_7(%arg0: i32) -> (i32, i32) {
    %c0_i32 = arith.constant 0 : i32
    %c0_i32_0 = arith.constant 0 : i32
    return %arg0, %c0_i32 : i32, i32
  }
}

</mosaic_0001>

<bundles_post_ra>
// kernel: _lambda_.1
= control target key start
LH: loop header
LB: loop body
LE: loop exit
PB: predicated region body
PF: predicated region fallthrough
CT: control target
= control target key end

     0   :  { %s1465_s24 = smov 0   ;;  %s1628_s0 = inlined_call_operand.vmem [shape: bf16[300,32], index: 0, kind: input, shape index: {}]   ;;  %s1629_s1 = inlined_call_operand.vmem [shape: bf16[32,128], index: 1, kind: input, shape index: {}]   ;;  %s1630_s2 = inlined_call_operand.vmem [shape: f32[1,128], index: 2, kind: input, shape index: {}]   ;;  %s1631_s3 = inlined_call_operand.vmem [shape: bf16[128,128], index: 3, kind: input, shape index: {}]   ;;  %s1632_s4 = inlined_call_operand.vmem [shape: f32[1,128], index: 4, kind: input, shape index: {}]   ;;  %s1633_s5 = inlined_call_operand.vmem [shape: bf16[128,128], index: 5, kind: input, shape index: {}]   ;;  %s1634_s6 = inlined_call_operand.vmem [shape: f32[1,128], index: 6, kind: input, shape index: {}]   ;;  %s1635_s7 = inlined_call_operand.vmem [shape: bf16[300,128], index: 7, kind: output, shape index: {}]  }
   0x1 LB: > { %s1092_s25 = sadd.s32 4294967295, %s1423_s24   ;;  %p1096_p0 = scmp.ge.s32.totalorder %s1423_s24, 1  ;;  %s1423_s24 = sphi %s1465_s24, %s17_s24  }
   0x2   : > { %p238_p1 = scmp.lt.s32.totalorder %s1423_s24, 3 }
   0x4   : > { %p239_p2 = pnand %p1096_p0, %p238_p1 }
   0x5   : > { %v1389_v0 = vld [vmem:[%s1629_s1] sm:$0xff] (!%p239_p2)   ;;  %s270_s28 = smul.u32 (!%p239_p2), 19, %s1092_s25  ;;  %v1390_v1 = vld [vmem:[%s1629_s1 + $0x8] sm:$0xff] (!%p239_p2)   ;;  %vm373_vm0 = vcmask (!%p239_p2), 261120   ;;  %v1403_v11 = vld [vmem:[%s1631_s3 + $0x10] sm:$0xff] (!%p239_p2)  }
   0x6   : > { %242 = sbr.rel (%p239_p2) target bundleno = 714 (0x2ca), region = 48  ;;  %1281 = vmatprep.subr.bf16.mxu0 (!%p239_p2), %v1389_v0  ;;  %1377 = vmatprep.subr.bf16.mxu1 (!%p239_p2), %v1389_v0  ;;  %v1401_v2 = vld [vmem:[%s1631_s3] sm:$0xff] (!%p239_p2)   ;;  %v1402_v8 = vld [vmem:[%s1631_s3 + $0x8] sm:$0xff] (!%p239_p2)   ;;  %v1404_v14 = vld [vmem:[%s1631_s3 + $0x18] sm:$0xff] (!%p239_p2)  }
   0x7   : > { %p271_p3 = scmp.lt.s32.totalorder (!%p239_p2), %s270_s28, 37  ;;  %1282 = vmatpush3.bf16.msra.mxu0 (!%p239_p2), %v1389_v0  ;;  %1379 = vmatpush3.bf16.msra.mxu1 (!%p239_p2), %v1389_v0  ;;  %v1405_v15 = vld [vmem:[%s1631_s3 + $0x20] sm:$0xff] (!%p239_p2)   ;;  %v1406_v17 = vld [vmem:[%s1631_s3 + $0x28] sm:$0xff] (!%p239_p2)   ;;  %v1407_v18 = vld [vmem:[%s1631_s3 + $0x30] sm:$0xff] (!%p239_p2)  }
   0x8   : > { %1283 = vmatprep.subr.bf16.mxu0 (!%p239_p2), %v1390_v1  ;;  %1378 = vmatprep.subr.bf16.mxu1 (!%p239_p2), %v1390_v1  ;;  %v1408_v19 = vld [vmem:[%s1631_s3 + $0x38] sm:$0xff] (!%p239_p2)   ;;  %v1409_v20 = vld [vmem:[%s1633_s5] sm:$0xff] (!%p239_p2)   ;;  %v1410_v21 = vld [vmem:[%s1633_s5 + $0x8] sm:$0xff] (!%p239_p2)  }
   0x9   : > { %v1411_v22 = vld [vmem:[%s1633_s5 + $0x10] sm:$0xff] (!%p239_p2)   ;;  %v1412_v23 = vld [vmem:[%s1633_s5 + $0x18] sm:$0xff] (!%p239_p2)   ;;  %v1413_v24 = vld [vmem:[%s1633_s5 + $0x20] sm:$0xff] (!%p239_p2)  }
   0xa   : > { %v1414_v25 = vld [vmem:[%s1633_s5 + $0x28] sm:$0xff] (!%p239_p2)   ;;  %v1554_v26 = vld [vmem:[%s1630_s2] ss:$0 sm:$0xff] (!%p239_p2) }
   0xb   : > { %1284 = vmatpush3.bf16.msra.mxu0 (!%p239_p2), %v1390_v1  ;;  %1380 = vmatpush3.bf16.msra.mxu1 (!%p239_p2), %v1390_v1 }
   0xc   : > { %1305 = vmatprep.subr.bf16.mxu1 (!%p239_p2), %v1401_v2  ;;  %1341 = vmatprep.subr.bf16.mxu0 (!%p239_p2), %v1409_v20 }
   0xd   : > { %s1637_s28 = smov (!%p271_p3, %s270_s28), 37 }
   0xe   : > { %s1097_s10 = sshll.u32 %s1637_s28, 2 }
   0xf   : > { %s1490_s13 = scalar_lea.vmem %s1628_s0, %s1097_s10  ;;  %s1613_s12 = scalar_lea.vmem %s1635_s7, %s1097_s10 }
  0x10   : > { %v1391_v3 = vld [vmem:[%s1490_s13] sm:$0xff]   ;;  %v1392_v4 = vld [vmem:[%s1490_s13 + $0x8] sm:$0xff]   ;;  %v1393_v5 = vld [vmem:[%s1490_s13 + $0x10] sm:$0xff]  }
  0x11   : > { %1285 = vmatprep.mubr.msk.bf16.mxu0 %vm373_vm0, %v1391_v3  ;;  %v1394_v6 = vld [vmem:[%s1490_s13 + $0x18] sm:$0xff]   ;;  %v1395_v7 = vld [vmem:[%s1490_s13 + $0x20] sm:$0xff]   ;;  %v1400_v10 = vld [vmem:[%s1490_s13 + $0x48] ss:$0 sps:$4 sm:$0xff]  }
  0x12   : > { %1286 = vmatmul.mubr.msk.bf16.vlgmr.msra.gmra.mrb[0].mxu0 %vm373_vm0, %v1392_v4  ;;  %v1399_v9 = vld [vmem:[%s1490_s13 + $0x40] sm:$0xff]   ;;  %v1396_v12 = vld [vmem:[%s1490_s13 + $0x28] sm:$0xff]   ;;  %v1397_v13 = vld [vmem:[%s1490_s13 + $0x30] sm:$0xff]  }
  0x13   : > { %1289 = vmatprep.mubr.msk.bf16.mxu0 %vm373_vm0, %v1393_v5  ;;  %1301 = vmatprep.mubr.msk.bf16.mxu1 %vm373_vm0, %v1399_v9  ;;  %v1398_v16 = vld [vmem:[%s1490_s13 + $0x38] sm:$0xff]  }
  0x14   : > { %1302 = vmatmul.mubr.msk.bf16.vlgmr.msra.gmra.mrb[0].mxu1 %vm373_vm0, %v1400_v10  ;;  %1342 = vmatpush3.bf16.msra.mxu0 %v1409_v20 }
  0x15   : > { %1306 = vmatpush3.bf16.msra.mxu1 %v1401_v2  ;;  %1343 = vmatprep.subr.bf16.mxu0 %v1410_v21 }
  0x16   : > { %1307 = vmatprep.subr.bf16.mxu1 %v1402_v8 }
  0x18   : > { %1344 = vmatpush3.bf16.msra.mxu0 %v1410_v21 }
  0x19   : > { %1308 = vmatpush3.bf16.msra.mxu1 %v1402_v8  ;;  %1345 = vmatprep.subr.bf16.mxu0 %v1411_v22 }
  0x1a   : > { %1290 = vmatmul.mubr.msk.bf16.gmra.mrb[4].mxu0 %vm373_vm0, %v1394_v6  ;;  %1309 = vmatprep.subr.bf16.mxu1 %v1403_v11 }
  0x1b   : > { %1293 = vmatprep.mubr.msk.bf16.mxu0 %vm373_vm0, %v1395_v7 }
  0x1c   : > { %1346 = vmatpush3.bf16.msra.mxu0 %v1411_v22 }
  0x1d   : > { %1310 = vmatpush3.bf16.msra.mxu1 %v1403_v11  ;;  %1347 = vmatprep.subr.bf16.mxu0 %v1412_v23 }
  0x1e   : > { %1311 = vmatprep.subr.bf16.mxu1 %v1404_v14 }
  0x20   : > { %1348 = vmatpush3.bf16.msra.mxu0 %v1412_v23 }
  0x21   : > { %1312 = vmatpush3.bf16.msra.mxu1 %v1404_v14  ;;  %1349 = vmatprep.subr.bf16.mxu0 %v1413_v24 }
  0x22   : > { %1294 = vmatmul.mubr.msk.bf16.gmra.mrb[8].mxu0 %vm373_vm0, %v1396_v12  ;;  %1313 = vmatprep.subr.bf16.mxu1 %v1405_v15 }
  0x23   : > { %1297 = vmatprep.mubr.msk.bf16.mxu0 %vm373_vm0, %v1397_v13 }
  0x24   : > { %1350 = vmatpush3.bf16.msra.mxu0 %v1413_v24 }
  0x25   : > { %1314 = vmatpush3.bf16.msra.mxu1 %v1405_v15  ;;  %1351 = vmatprep.subr.bf16.mxu0 %v1414_v25 }
  0x26   : > { %1315 = vmatprep.subr.bf16.mxu1 %v1406_v17 }
  0x28   : > { %1352 = vmatpush3.bf16.msra.mxu0 %v1414_v25 }
  0x29   : > { %1316 = vmatpush3.bf16.msra.mxu1 %v1406_v17 }
  0x2a   : > { %1298 = vmatmul.mubr.msk.bf16.gmra.mrb[12].mxu0 %vm373_vm0, %v1398_v16  ;;  %1317 = vmatprep.subr.bf16.mxu1 %v1407_v18 }
  0x2d   : > { %1318 = vmatpush3.bf16.msra.mxu1 %v1407_v18 }
  0x2e   : > { %1319 = vmatprep.subr.bf16.mxu1 %v1408_v19 }
  0x31   : > { %1320 = vmatpush3.bf16.msra.mxu1 %v1408_v19 }
  0xe5   : > { %v1287_v27 = vpop.f32.mrb[0].mxu0 }
  0xe6   : > { %v447_v28 = vadd.f32 %v1287_v27, %v1554_v26  ;;  %v438_v29 = vpop.f32.mrb[1].mxu0 }
  0xe7   : > { %v439_v30 = vadd.f32 %v1554_v26, %v438_v29  ;;  %v1288_v31 = vpop.f32.mrb[2].mxu0  ;;  %v1303_v42 = vpop.f32.mrb[0].mxu1 }
  0xe8   : > { %v450_v32 = vadd.f32 %v1288_v31, %v1554_v26  ;;  %v441_v33 = vpop.f32.mrb[3].mxu0  ;;  %v518_v35 = vmax.f32 %v447_v28, 0.0  ;;  %v502_v45 = vpop.f32.mrb[1].mxu1  ;;  %v511_v29 = vadd.f32 %v1303_v42, %v1554_v26 }
  0xe9   : > { %v442_v34 = vadd.f32 %v1554_v26, %v441_v33  ;;  %v516_v37 = vmax.f32 %v439_v30, 0.0  ;;  %v503_v48 = vadd.f32 %v1554_v26, %v502_v45  ;;  %v1304_v49 = vpop.f32.mrb[2].mxu1  ;;  %v1416_v33 = vld [vmem:[%s1633_s5 + $0x38] sm:$0xff]  }
  0xea   : > { %v519_v36 = vmax.f32 %v450_v32, 0.0  ;;  %v505_v52 = vpop.f32.mrb[3].mxu1  ;;  %v534_v30 = vmax.f32 %v511_v29, 0.0  ;;  %v1415_v32 = vld [vmem:[%s1633_s5 + $0x30] sm:$0xff]  }
  0xeb   : > { %v517_v38 = vmax.f32 %v442_v34, 0.0  ;;  %v532_v54 = vmax.f32 %v503_v48, 0.0  ;;  %v506_v55 = vadd.f32 %v1554_v26, %v505_v52  ;;  %1353 = vmatprep.subr.bf16.mxu0 %v1415_v32 }
  0xec   : > { %v536_v39 = vpack.c.bf16 %v519_v36, %v518_v35  ;;  %v544_v31 = vpack.c.bf16 %v534_v30, %v534_v30  ;;  %1354 = vmatpush3.bf16.msra.mxu0 %v1415_v32 }
  0xed   : > { %v535_v40 = vpack.c.bf16 %v517_v38, %v516_v37  ;;  %v1291_v41 = vpop.f32.mrb[4].mxu0  ;;  %v533_v60 = vmax.f32 %v506_v55, 0.0  ;;  %1355 = vmatprep.subr.bf16.mxu0 %v1416_v33 }
  0xee   : > { %v463_v43 = vadd.f32 %v1291_v41, %v1554_v26  ;;  %v454_v44 = vpop.f32.mrb[5].mxu0 }
  0xef   : > { %v455_v46 = vadd.f32 %v1554_v26, %v454_v44  ;;  %v1292_v47 = vpop.f32.mrb[6].mxu0  ;;  %1321 = vmatprep.mubr.bf16.mxu1 %v535_v40  ;;  %v543_v0 = vpack.c.bf16 %v533_v60, %v532_v54 }
  0xf0   : > { %v466_v50 = vadd.f32 %v1292_v47, %v1554_v26  ;;  %v457_v51 = vpop.f32.mrb[7].mxu0  ;;  %1322 = vmatmul.mubr.bf16.vlgmr.msra.gmra.mrb[4].mxu1 %v536_v39  ;;  %v522_v56 = vmax.f32 %v463_v43, 0.0  ;;  %1356 = vmatpush3.bf16.msra.mxu0 %v1416_v33 }
  0xf1   : > { %v458_v53 = vadd.f32 %v1554_v26, %v457_v51  ;;  %v520_v58 = vmax.f32 %v455_v46, 0.0 }
  0xf2   : > { %v523_v57 = vmax.f32 %v466_v50, 0.0 }
  0xf3   : > { %v521_v59 = vmax.f32 %v458_v53, 0.0 }
  0xf4   : > { %v538_v61 = vpack.c.bf16 %v523_v57, %v522_v56 }
  0xf5   : > { %v537_v62 = vpack.c.bf16 %v521_v59, %v520_v58  ;;  %v1295_v63 = vpop.f32.mrb[8].mxu0 }
  0xf6   : > { %v479_v1 = vadd.f32 %v1295_v63, %v1554_v26  ;;  %v470_v2 = vpop.f32.mrb[9].mxu0 }
  0xf7   : > { %v471_v3 = vadd.f32 %v1554_v26, %v470_v2  ;;  %v1296_v4 = vpop.f32.mrb[10].mxu0  ;;  %1325 = vmatprep.mubr.bf16.mxu1 %v537_v62 }
  0xf8   : > { %v482_v5 = vadd.f32 %v1296_v4, %v1554_v26  ;;  %v473_v6 = vpop.f32.mrb[11].mxu0  ;;  %1326 = vmatmul.mubr.bf16.gmra.mrb[8].mxu1 %v538_v61  ;;  %v526_v8 = vmax.f32 %v479_v1, 0.0 }
  0xf9   : > { %v474_v7 = vadd.f32 %v1554_v26, %v473_v6  ;;  %v524_v10 = vmax.f32 %v471_v3, 0.0 }
  0xfa   : > { %v527_v9 = vmax.f32 %v482_v5, 0.0 }
  0xfb   : > { %v525_v11 = vmax.f32 %v474_v7, 0.0 }
  0xfc   : > { %v540_v12 = vpack.c.bf16 %v527_v9, %v526_v8 }
  0xfd   : > { %v539_v13 = vpack.c.bf16 %v525_v11, %v524_v10  ;;  %v1299_v14 = vpop.f32.mrb[12].mxu0 }
  0xfe   : > { %v495_v15 = vadd.f32 %v1299_v14, %v1554_v26  ;;  %v486_v16 = vpop.f32.mrb[13].mxu0 }
  0xff   : > { %v487_v17 = vadd.f32 %v1554_v26, %v486_v16  ;;  %v1300_v18 = vpop.f32.mrb[14].mxu0  ;;  %1329 = vmatprep.mubr.bf16.mxu1 %v539_v13 }
 0x100   : > { %v498_v19 = vadd.f32 %v1300_v18, %v1554_v26  ;;  %v489_v20 = vpop.f32.mrb[15].mxu0  ;;  %1330 = vmatmul.mubr.bf16.gmra.mrb[12].mxu1 %v540_v12  ;;  %v530_v22 = vmax.f32 %v495_v15, 0.0 }
 0x101   : > { %v490_v21 = vadd.f32 %v1554_v26, %v489_v20  ;;  %v528_v24 = vmax.f32 %v487_v17, 0.0  ;;  %v1584_v26 = vld [vmem:[%s1632_s4] ss:$0 sm:$0xff] }
 0x102   : > { %v531_v23 = vmax.f32 %v498_v19, 0.0 }
 0x103   : > { %v529_v25 = vmax.f32 %v490_v21, 0.0 }
 0x104   : > { %v542_v27 = vpack.c.bf16 %v531_v23, %v530_v22 }
 0x105   : > { %v541_v28 = vpack.c.bf16 %v529_v25, %v528_v24 }
 0x107   : > { %1333 = vmatprep.mubr.bf16.mxu1 %v541_v28 }
 0x108   : > { %1334 = vmatmul.mubr.bf16.gmra.mrb[16].mxu1 %v542_v27 }
 0x109   : > { %1337 = vmatprep.mubr.bf16.mxu1 %v543_v0 }
 0x110   : > { %1338 = vmatmul.mubr.bf16.gmra.mrb[20].mxu1 %v544_v31 }
 0x1c3   : > { %v1323_v34 = vpop.f32.mrb[4].mxu1 }
 0x1c4   : > { %v659_v35 = vadd.f32 %v1323_v34, %v1584_v26  ;;  %v650_v36 = vpop.f32.mrb[5].mxu1 }
 0x1c5   : > { %v651_v37 = vadd.f32 %v1584_v26, %v650_v36  ;;  %v1324_v38 = vpop.f32.mrb[6].mxu1 }
 0x1c6   : > { %v662_v39 = vadd.f32 %v1324_v38, %v1584_v26  ;;  %v653_v40 = vpop.f32.mrb[7].mxu1  ;;  %v730_v42 = vmax.f32 %v659_v35, 0.0 }
 0x1c7   : > { %v654_v41 = vadd.f32 %v1584_v26, %v653_v40  ;;  %v728_v44 = vmax.f32 %v651_v37, 0.0  ;;  %v1131_v40 = vld [vmem:[%s1634_s6] ss:$0 sm:$0xff] }
 0x1c8   : > { %v731_v43 = vmax.f32 %v662_v39, 0.0 }
 0x1c9   : > { %v729_v45 = vmax.f32 %v654_v41, 0.0 }
 0x1ca   : > { %v748_v46 = vpack.c.bf16 %v731_v43, %v730_v42 }
 0x1cb   : > { %v747_v47 = vpack.c.bf16 %v729_v45, %v728_v44  ;;  %v1327_v48 = vpop.f32.mrb[8].mxu1 }
 0x1cc   : > { %v675_v49 = vadd.f32 %v1327_v48, %v1584_v26  ;;  %v666_v50 = vpop.f32.mrb[9].mxu1 }
 0x1cd   : > { %v667_v51 = vadd.f32 %v1584_v26, %v666_v50  ;;  %v1328_v52 = vpop.f32.mrb[10].mxu1  ;;  %1357 = vmatprep.mubr.bf16.mxu0 %v747_v47 }
 0x1ce   : > { %v678_v53 = vadd.f32 %v1328_v52, %v1584_v26  ;;  %v669_v54 = vpop.f32.mrb[11].mxu1  ;;  %1358 = vmatmul.mubr.bf16.vlgmr.msra.gmra.mrb[16].mxu0 %v748_v46  ;;  %v734_v56 = vmax.f32 %v675_v49, 0.0 }
 0x1cf   : > { %v670_v55 = vadd.f32 %v1584_v26, %v669_v54  ;;  %v732_v58 = vmax.f32 %v667_v51, 0.0 }
 0x1d0   : > { %v735_v57 = vmax.f32 %v678_v53, 0.0 }
 0x1d1   : > { %v733_v59 = vmax.f32 %v670_v55, 0.0 }
 0x1d2   : > { %v750_v60 = vpack.c.bf16 %v735_v57, %v734_v56 }
 0x1d3   : > { %v749_v61 = vpack.c.bf16 %v733_v59, %v732_v58  ;;  %v1331_v62 = vpop.f32.mrb[12].mxu1 }
 0x1d4   : > { %v691_v63 = vadd.f32 %v1331_v62, %v1584_v26  ;;  %v682_v0 = vpop.f32.mrb[13].mxu1 }
 0x1d5   : > { %v683_v1 = vadd.f32 %v1584_v26, %v682_v0  ;;  %v1332_v2 = vpop.f32.mrb[14].mxu1  ;;  %1361 = vmatprep.mubr.bf16.mxu0 %v749_v61 }
 0x1d6   : > { %v694_v3 = vadd.f32 %v1332_v2, %v1584_v26  ;;  %v685_v4 = vpop.f32.mrb[15].mxu1  ;;  %1362 = vmatmul.mubr.bf16.gmra.mrb[20].mxu0 %v750_v60  ;;  %v738_v6 = vmax.f32 %v691_v63, 0.0 }
 0x1d7   : > { %v686_v5 = vadd.f32 %v1584_v26, %v685_v4  ;;  %v736_v8 = vmax.f32 %v683_v1, 0.0 }
 0x1d8   : > { %v739_v7 = vmax.f32 %v694_v3, 0.0 }
 0x1d9   : > { %v737_v9 = vmax.f32 %v686_v5, 0.0 }
 0x1da   : > { %v752_v10 = vpack.c.bf16 %v739_v7, %v738_v6 }
 0x1db   : > { %v751_v11 = vpack.c.bf16 %v737_v9, %v736_v8  ;;  %v1335_v12 = vpop.f32.mrb[16].mxu1 }
 0x1dc   : > { %v707_v13 = vadd.f32 %v1335_v12, %v1584_v26  ;;  %v698_v14 = vpop.f32.mrb[17].mxu1 }
 0x1dd   : > { %v699_v15 = vadd.f32 %v1584_v26, %v698_v14  ;;  %v1336_v16 = vpop.f32.mrb[18].mxu1  ;;  %1365 = vmatprep.mubr.bf16.mxu0 %v751_v11 }
 0x1de   : > { %v710_v17 = vadd.f32 %v1336_v16, %v1584_v26  ;;  %v701_v18 = vpop.f32.mrb[19].mxu1  ;;  %1366 = vmatmul.mubr.bf16.gmra.mrb[24].mxu0 %v752_v10  ;;  %v742_v20 = vmax.f32 %v707_v13, 0.0 }
 0x1df   : > { %v702_v19 = vadd.f32 %v1584_v26, %v701_v18  ;;  %v740_v22 = vmax.f32 %v699_v15, 0.0 }
 0x1e0   : > { %v743_v21 = vmax.f32 %v710_v17, 0.0 }
 0x1e1   : > { %v741_v23 = vmax.f32 %v702_v19, 0.0 }
 0x1e2   : > { %v754_v24 = vpack.c.bf16 %v743_v21, %v742_v20 }
 0x1e3   : > { %v753_v25 = vpack.c.bf16 %v741_v23, %v740_v22  ;;  %v1339_v27 = vpop.f32.mrb[20].mxu1 }
 0x1e4   : > { %v723_v28 = vadd.f32 %v1339_v27, %v1584_v26  ;;  %v714_v29 = vpop.f32.mrb[21].mxu1 }
 0x1e5   : > { %v715_v30 = vadd.f32 %v1584_v26, %v714_v29  ;;  %v1340_v31 = vpop.f32.mrb[22].mxu1  ;;  %1369 = vmatprep.mubr.bf16.mxu0 %v753_v25 }
 0x1e6   : > { %v717_v32 = vpop.f32.mrb[23].mxu1  ;;  %1370 = vmatmul.mubr.bf16.gmra.mrb[28].mxu0 %v754_v24  ;;  %v746_v34 = vmax.f32 %v723_v28, 0.0 }
 0x1e7   : > { %v718_v33 = vadd.f32 %v1584_v26, %v717_v32  ;;  %v744_v35 = vmax.f32 %v715_v30, 0.0 }
 0x1e8   : > { %v756_v38 = vpack.c.bf16 %v746_v34, %v746_v34 }
 0x1e9   : > { %v745_v36 = vmax.f32 %v718_v33, 0.0 }
 0x1eb   : > { %v755_v37 = vpack.c.bf16 %v745_v36, %v744_v35 }
 0x1ed   : > { %1373 = vmatprep.mubr.bf16.mxu0 %v755_v37 }
 0x1ee   : > { %1374 = vmatmul.mubr.bf16.gmra.mrb[32].mxu0 %v756_v38 }
 0x2a1   : > { %v1359_v39 = vpop.f32.mrb[16].mxu0 }
 0x2a2   : > { %v862_v41 = vpop.f32.mrb[17].mxu0  ;;  %v871_v43 = vadd.f32 %v1359_v39, %v1131_v40 }
 0x2a3   : > { %v1360_v42 = vpop.f32.mrb[18].mxu0  ;;  %v863_v46 = vadd.f32 %v1131_v40, %v862_v41 }
 0x2a4   : > { %v874_v44 = vadd.f32 %v1360_v42, %v1131_v40  ;;  %v865_v45 = vpop.f32.mrb[19].mxu0 }
 0x2a5   : > { %v866_v26 = vadd.f32 %v1131_v40, %v865_v45 }
 0x2a6   : > { %v1188_v47 = vpack.c.bf16 %v874_v44, %v871_v43 }
 0x2a7   : > { %v1183_v48 = vpack.c.bf16 %v866_v26, %v863_v46 }
 0x2a8   : > { %1225 = vst [vmem:[%s1613_s12 + $0x8] sm:$0xff] %v1188_v47  }
 0x2a9   : > { %1184 = vst [vmem:[%s1613_s12] sm:$0xff] %v1183_v48   ;;  %v1363_v49 = vpop.f32.mrb[20].mxu0 }
 0x2aa   : > { %v878_v50 = vpop.f32.mrb[21].mxu0  ;;  %v887_v52 = vadd.f32 %v1363_v49, %v1131_v40 }
 0x2ab   : > { %v1364_v51 = vpop.f32.mrb[22].mxu0  ;;  %v879_v55 = vadd.f32 %v1131_v40, %v878_v50 }
 0x2ac   : > { %v890_v53 = vadd.f32 %v1364_v51, %v1131_v40  ;;  %v881_v54 = vpop.f32.mrb[23].mxu0 }
 0x2ad   : > { %v882_v56 = vadd.f32 %v1131_v40, %v881_v54 }
 0x2ae   : > { %v1198_v57 = vpack.c.bf16 %v890_v53, %v887_v52 }
 0x2af   : > { %v1193_v58 = vpack.c.bf16 %v882_v56, %v879_v55 }
 0x2b0   : > { %1227 = vst [vmem:[%s1613_s12 + $0x18] sm:$0xff] %v1198_v57  }
 0x2b1   : > { %1226 = vst [vmem:[%s1613_s12 + $0x10] sm:$0xff] %v1193_v58   ;;  %v1367_v59 = vpop.f32.mrb[24].mxu0 }
 0x2b2   : > { %v894_v60 = vpop.f32.mrb[25].mxu0  ;;  %v903_v62 = vadd.f32 %v1367_v59, %v1131_v40 }
 0x2b3   : > { %v1368_v61 = vpop.f32.mrb[26].mxu0  ;;  %v895_v1 = vadd.f32 %v1131_v40, %v894_v60 }
 0x2b4   : > { %v906_v63 = vadd.f32 %v1368_v61, %v1131_v40  ;;  %v897_v0 = vpop.f32.mrb[27].mxu0 }
 0x2b5   : > { %v898_v2 = vadd.f32 %v1131_v40, %v897_v0 }
 0x2b6   : > { %v1208_v3 = vpack.c.bf16 %v906_v63, %v903_v62 }
 0x2b7   : > { %v1203_v4 = vpack.c.bf16 %v898_v2, %v895_v1 }
 0x2b8   : > { %1229 = vst [vmem:[%s1613_s12 + $0x28] sm:$0xff] %v1208_v3  }
 0x2b9   : > { %1228 = vst [vmem:[%s1613_s12 + $0x20] sm:$0xff] %v1203_v4   ;;  %v1371_v5 = vpop.f32.mrb[28].mxu0 }
 0x2ba   : > { %v910_v6 = vpop.f32.mrb[29].mxu0  ;;  %v919_v8 = vadd.f32 %v1371_v5, %v1131_v40 }
 0x2bb   : > { %v1372_v7 = vpop.f32.mrb[30].mxu0  ;;  %v911_v11 = vadd.f32 %v1131_v40, %v910_v6 }
 0x2bc   : > { %v922_v9 = vadd.f32 %v1372_v7, %v1131_v40  ;;  %v913_v10 = vpop.f32.mrb[31].mxu0 }
 0x2bd   : > { %v914_v12 = vadd.f32 %v1131_v40, %v913_v10 }
 0x2be   : > { %v1218_v13 = vpack.c.bf16 %v922_v9, %v919_v8 }
 0x2bf   : > { %v1213_v14 = vpack.c.bf16 %v914_v12, %v911_v11 }
 0x2c0   : > { %1231 = vst [vmem:[%s1613_s12 + $0x38] sm:$0xff] %v1218_v13  }
 0x2c1   : > { %1230 = vst [vmem:[%s1613_s12 + $0x30] sm:$0xff] %v1213_v14   ;;  %v1375_v15 = vpop.f32.mrb[32].mxu0 }
 0x2c2   : > { %v935_v16 = vadd.f32 %v1375_v15, %v1131_v40  ;;  %v926_v17 = vpop.f32.mrb[33].mxu0 }
 0x2c3   : > { %v1376_v18 = vpop.f32.mrb[34].mxu0  ;;  %v927_v21 = vadd.f32 %v1131_v40, %v926_v17 }
 0x2c4   : > { %v1179_v19 = vpack.c.bf16 %v935_v16, %v935_v16  ;;  %v929_v20 = vpop.f32.mrb[35].mxu0 }
 0x2c5   : > { %v930_v22 = vadd.f32 %v1131_v40, %v929_v20 }
 0x2c6   : > { %1035 = vst [vmem:[%s1613_s12 + $0x48] sm:$0xf] %v1179_v19 }
 0x2c7   : > { %v1223_v23 = vpack.c.bf16 %v930_v22, %v927_v21 }
 0x2c9   : > { %1232 = vst [vmem:[%s1613_s12 + $0x40] sm:$0xff] %v1223_v23  }
 0x2ca PF: > { %s17_s24 = sadd.s32 1, %s1423_s24  }
 0x2cb   : > { %p14_p4 = scmp.ge.s32.totalorder %s17_s24, 4  }
 0x2cd   :  { %16 = sbr.rel (!%p14_p4) target bundleno = 1 (0x1), region = 78 }

</bundles_post_ra>
